<compile_context>
chip_gen: v7x
topology: tpu7x:2x2x1
jax: 0.10.0
libtpu: 0.0.40
codegen_flags: <defaults>
</compile_context>

<pallas_src>
import math
import functools

import jax
import jax.numpy as jnp
from jax.experimental import pallas as pl
from jax.experimental.pallas import tpu as pltpu


def _tr_kernel(x_ref, w_ref, ffn_ref, o_ref, *, num_heads):
    # x_ref:   (Bg, L, Dq+Dk+Dv+1)   activations [q | k | v | 1] along lanes
    # w_ref:   (Dq+Dk+Dv+1, (3+H)*E) block-diagonal fused weights, last row = biases
    # ffn_ref: (E+1, hidden)         LayerNorm-affine-folded FFN weights + bias row
    Bg, L, Din = x_ref.shape
    H = num_heads
    E = w_ref.shape[1] // (3 + H)
    hd = E // H
    hidden = ffn_ref.shape[1]

    # ---- single block-diagonal projection matmul (bias folded via ones-lane) ----
    x2 = x_ref[...].reshape(Bg * L, Din)
    proj = jnp.dot(x2, w_ref[...], preferred_element_type=jnp.float32)
    # column layout: [ q_e(+out_b) | Q*scale | K | V'_0 | ... | V'_{H-1} ]
    q_e = proj[:, 0:E]                              # residual term (out_b folded in)
    Q3 = proj[:, E:2 * E].reshape(Bg, L, E)         # 1/sqrt(hd) folded into weights
    K3 = proj[:, 2 * E:3 * E].reshape(Bg, L, E)

    # ---- attention: per-head scores/softmax/context; out_w already folded into V'
    #      so the head results are just summed (no concat, no out-projection matmul).
    attn_parts = []
    for h in range(H):
        sl = slice(h * hd, (h + 1) * hd)
        s = jnp.einsum('bqd,bkd->bqk', Q3[:, :, sl], K3[:, :, sl],
                       preferred_element_type=jnp.float32)          # (Bg, L, L)
        s = s - jnp.max(s, axis=-1, keepdims=True)
        p = jnp.exp(s)
        # approx reciprocal (EUP slot); eval-mode only -- rows sum to 1 +/- ~1e-3.
        p = p * pl.reciprocal(jnp.sum(p, axis=-1, keepdims=True), approx=True)
        # TODO(synk): attention dropout omitted (eval-mode semantics only).
        vph = proj[:, (3 + h) * E:(4 + h) * E].reshape(Bg, L, E)    # V'_h (out_w folded)
        ctx = jnp.einsum('bqk,bkd->bqd', p, vph,
                         preferred_element_type=jnp.float32)         # (Bg, L, E)
        attn_parts.append(ctx.reshape(Bg * L, E))
    attn_o = attn_parts[0]
    for part in attn_parts[1:]:
        attn_o = attn_o + part

    # ---- residual + LayerNorm (eps = 1e-5; gamma/beta folded into FFN weights) ----
    x = q_e + attn_o
    mu = jnp.mean(x, axis=-1, keepdims=True)
    xc = x - mu
    var = jnp.mean(xc * xc, axis=-1, keepdims=True)
    xn = xc * jax.lax.rsqrt(var + 1e-5)

    # ---- FFN: lane-dense (hidden = 128) output ----
    y = jnp.dot(xn, ffn_ref[0:E, :], preferred_element_type=jnp.float32) \
        + ffn_ref[E:E + 1, :]
    o_ref[...] = y.reshape(Bg, L, hidden)


def tr_layer_forward(q, k, v, params, *, num_heads, batch_splits=1):
    B, Lq, Dq = q.shape
    Bk, Lk, Dk = k.shape
    Bv, Lv, Dv = v.shape
    assert B == Bk == Bv and Lk == Lv
    # TODO(synk): the fused lane-concat path requires Lq == Lk; differing q/k lengths
    # would need separate projection matmuls (fall back to the unfused variant).
    assert Lq == Lk, "fused projection path requires equal q/k sequence lengths"

    E = params["wq"].shape[1]
    H = num_heads
    assert E % H == 0
    hd = E // H
    hidden = params["ffn_w"].shape[1]
    scale = 1.0 / math.sqrt(hd)
    f32 = jnp.float32

    wq, bq = params["wq"].astype(f32), params["bq"].astype(f32)
    wk, bk = params["wk"].astype(f32), params["bk"].astype(f32)
    wv, bv = params["wv"].astype(f32), params["bv"].astype(f32)
    in_w, in_b = params["in_w"].astype(f32), params["in_b"].astype(f32)
    out_w, out_b = params["out_w"].astype(f32), params["out_b"].astype(f32)
    gamma, beta = params["gamma"].astype(f32), params["beta"].astype(f32)
    ffn_w, ffn_b = params["ffn_w"].astype(f32), params["ffn_b"].astype(f32)

    in_wq, in_bq = in_w[:, :E], in_b[:, :E]
    in_wk, in_bk = in_w[:, E:2 * E], in_b[:, E:2 * E]
    in_wv, in_bv = in_w[:, 2 * E:], in_b[:, 2 * E:]

    # ---- offline weight fusion (all matmul folds done once, outside the kernel) ----
    # q columns: residual embed (attention out_proj bias folded in) + scaled query.
    w_qe, b_qe = wq, bq + out_b
    w_Q, b_Q = (wq @ in_wq) * scale, (bq @ in_wq + in_bq) * scale
    # k columns: k embed fused with k in-projection.
    w_K, b_K = wk @ in_wk, bk @ in_wk + in_bk
    # v columns: v embed fused with v in-projection AND per-head out-projection.
    wv_f, bv_f = wv @ in_wv, bv @ in_wv + in_bv
    w_V = [wv_f[:, h * hd:(h + 1) * hd] @ out_w[h * hd:(h + 1) * hd, :]
           for h in range(H)]
    b_V = [bv_f[:, h * hd:(h + 1) * hd] @ out_w[h * hd:(h + 1) * hd, :]
           for h in range(H)]

    # Block-diagonal projection slab; last row holds all biases (activated by the
    # ones-lane appended to the activations), so the kernel needs no bias adds and
    # no row-slicing of weights.
    zq = jnp.zeros((Dq, E), f32)
    zk = jnp.zeros((Dk, E), f32)
    zv = jnp.zeros((Dv, E), f32)
    q_rows = jnp.concatenate([w_qe, w_Q] + [zq] * (1 + H), axis=1)
    k_rows = jnp.concatenate([zk, zk, w_K] + [zk] * H, axis=1)
    v_rows = jnp.concatenate([zv, zv, zv] + w_V, axis=1)
    bias_row = jnp.concatenate([b_qe, b_Q, b_K] + b_V, axis=1)
    w_big = jnp.concatenate([q_rows, k_rows, v_rows, bias_row], axis=0)
    assert w_big.shape == (Dq + Dk + Dv + 1, (3 + H) * E)

    # LayerNorm affine folded into the FFN.
    ffn_w_f = gamma.reshape(E, 1) * ffn_w
    ffn_b_f = beta @ ffn_w + ffn_b
    ffn_pack = jnp.concatenate([ffn_w_f, ffn_b_f], axis=0)          # (E+1, hidden)

    # Activations concatenated along lanes; trailing ones-lane drives the bias row.
    ones = jnp.ones((B, Lq, 1), f32)
    x_cat = jnp.concatenate([q.astype(f32), k.astype(f32), v.astype(f32), ones],
                            axis=-1)                                 # (B, L, Dq+Dk+Dv+1)
    Din = x_cat.shape[-1]

    assert B % batch_splits == 0
    Bg = B // batch_splits  # batches processed per grid step

    kernel = functools.partial(_tr_kernel, num_heads=num_heads)

    # NOTE: with grid=(1,) there is no pipelining; if this layer is called with a
    # much larger batch/sequence, grow the grid over batch so BlockSpec overlaps the
    # activation DMAs with compute, and consider cross-call prefetch of the constant
    # slabs.  VMEM working set is a few KB today; set vmem_limit_bytes explicitly
    # only if E/L scale up (v7x has 64 MiB physical).
    return pl.pallas_call(
        kernel,
        out_shape=jax.ShapeDtypeStruct((B, Lq, hidden), jnp.float32),
        grid_spec=pltpu.PrefetchScalarGridSpec(
            num_scalar_prefetch=0,
            grid=(batch_splits,),
            in_specs=[
                pl.BlockSpec((Bg, Lq, Din), lambda g: (g, 0, 0)),
                pl.BlockSpec(w_big.shape, lambda g: (0, 0)),
                pl.BlockSpec(ffn_pack.shape, lambda g: (0, 0)),
            ],
            out_specs=pl.BlockSpec((Bg, Lq, hidden), lambda g: (g, 0, 0)),
        ),
        compiler_params=pltpu.CompilerParams(
            dimension_semantics=("parallel",)),
    )(x_cat, w_big, ffn_pack)


def _ref_forward(q, k, v, p, *, num_heads):
    """Pure-JAX reference mirroring the PyTorch module (eval mode)."""
    E = p["wq"].shape[1]
    hd = E // num_heads
    q_e = q @ p["wq"] + p["bq"][0]
    k_e = k @ p["wk"] + p["bk"][0]
    v_e = v @ p["wv"] + p["bv"][0]
    Q = q_e @ p["in_w"][:, :E] + p["in_b"][0, :E]
    K = k_e @ p["in_w"][:, E:2 * E] + p["in_b"][0, E:2 * E]
    V = v_e @ p["in_w"][:, 2 * E:] + p["in_b"][0, 2 * E:]
    B, Lq, _ = Q.shape
    Lk = K.shape[1]
    Qh = Q.reshape(B, Lq, num_heads, hd).transpose(0, 2, 1, 3)
    Kh = K.reshape(B, Lk, num_heads, hd).transpose(0, 2, 1, 3)
    Vh = V.reshape(B, Lk, num_heads, hd).transpose(0, 2, 1, 3)
    s = jnp.einsum("bhqd,bhkd->bhqk", Qh, Kh) / math.sqrt(hd)
    pmat = jax.nn.softmax(s, axis=-1)
    o = jnp.einsum("bhqk,bhkd->bhqd", pmat, Vh).transpose(0, 2, 1, 3).reshape(B, Lq, E)
    attn_o = o @ p["out_w"] + p["out_b"][0]
    x = q_e + attn_o
    mu = x.mean(-1, keepdims=True)
    var = ((x - mu) ** 2).mean(-1, keepdims=True)
    xn = (x - mu) / jnp.sqrt(var + 1e-5) * p["gamma"][0] + p["beta"][0]
    return xn @ p["ffn_w"] + p["ffn_b"][0]


if __name__ == "__main__":
    # Module config: hidden_dim=128 -> embed_dim = 128 // 16 = 8, num_heads=2.
    B, Lq, Lk = 2, 8, 8
    q_in, k_in, v_in = 16, 12, 20
    hidden_dim, num_heads = 128, 2
    E = hidden_dim // 16

    key = jax.random.PRNGKey(0)
    keys = jax.random.split(key, 16)

    def randn(kk, shape, scale=0.1):
        return (scale * jax.random.normal(kk, shape)).astype(jnp.float32)

    # Weights stored (in_features, out_features); biases stored (1, out_features).
    params = {
        "wq": randn(keys[0], (q_in, E)),      "bq": randn(keys[1], (1, E)),
        "wk": randn(keys[2], (k_in, E)),      "bk": randn(keys[3], (1, E)),
        "wv": randn(keys[4], (v_in, E)),      "bv": randn(keys[5], (1, E)),
        "in_w": randn(keys[6], (E, 3 * E)),   "in_b": randn(keys[7], (1, 3 * E)),
        "out_w": randn(keys[8], (E, E)),      "out_b": randn(keys[9], (1, E)),
        "gamma": jnp.ones((1, E), jnp.float32),
        "beta": jnp.zeros((1, E), jnp.float32),
        "ffn_w": randn(keys[10], (E, hidden_dim)), "ffn_b": randn(keys[11], (1, hidden_dim)),
    }

    q = randn(keys[12], (B, Lq, q_in), scale=1.0)
    k = randn(keys[13], (B, Lk, k_in), scale=1.0)
    v = randn(keys[14], (B, Lk, v_in), scale=1.0)

    # batch_splits=1 on all generations at this problem size (per-step overhead and
    # duplicated weight DMAs on a second TensorCore exceed one step's compute).
    out = tr_layer_forward(q, k, v, params, num_heads=num_heads, batch_splits=1)
    out = jax.block_until_ready(out)

    ref = _ref_forward(q, k, v, params, num_heads=num_heads)
    assert out.shape == (B, Lq, hidden_dim)
    # Tolerance accounts for pl.reciprocal(approx=True) in the softmax denominator
    # and the offline f32 weight-fusion reassociation.
    assert jnp.allclose(out, ref, atol=2e-3, rtol=2e-3), "mismatch vs. reference"

    print("KERNEL_OK")
</pallas_src>

<mosaic_0001>
module attributes {stable_mosaic.version = 11 : i64} {
  func.func @_tr_kernel(%arg0: i32, %arg1: memref<2x8x49xf32, #tpu.memory_space<vmem>>, %arg2: memref<49x40xf32, #tpu.memory_space<vmem>>, %arg3: memref<9x128xf32, #tpu.memory_space<vmem>>, %arg4: memref<2x8x128xf32, #tpu.memory_space<vmem>>) attributes {dimension_semantics = [#tpu.dimension_semantics<parallel>], iteration_bounds = array<i64: 1>, scalar_prefetch = 0 : i64, scratch_operands = 0 : i64, tpu.core_type = #tpu.core_type<tc>, window_params = [{transform_indices = @transform_0, window_bounds = array<i64: 2, 8, 49>}, {pipeline_mode = #tpu.pipeline_mode<synchronous>, transform_indices = @transform_1, window_bounds = array<i64: 49, 40>}, {pipeline_mode = #tpu.pipeline_mode<synchronous>, transform_indices = @transform_2, window_bounds = array<i64: 9, 128>}, {transform_indices = @transform_3, window_bounds = array<i64: 2, 8, 128>}]} {
    %c0 = arith.constant 0 : index
    %c0_0 = arith.constant 0 : index
    %c0_1 = arith.constant 0 : index
    %0 = vector.load %arg1[%c0, %c0_0, %c0_1] : memref<2x8x49xf32, #tpu.memory_space<vmem>>, vector<2x8x49xf32>
    %1 = vector.shape_cast %0 : vector<2x8x49xf32> to vector<16x49xf32>
    %c0_2 = arith.constant 0 : index
    %c0_3 = arith.constant 0 : index
    %2 = vector.load %arg2[%c0_2, %c0_3] : memref<49x40xf32, #tpu.memory_space<vmem>>, vector<49x40xf32>
    %cst = arith.constant dense<0.000000e+00> : vector<16x40xf32>
    %3 = tpu.matmul %1, %2, %cst {dimension_numbers = #tpu.dot_dimension_numbers<[1], [0], [0], [1], [0, 0, 1, 1], [], []>} : vector<16x49xf32>, vector<49x40xf32>, vector<16x40xf32> -> vector<16x40xf32>
    %4 = vector.extract_strided_slice %3 {offsets = [0, 0], sizes = [16, 8], strides = [1, 1]} : vector<16x40xf32> to vector<16x8xf32>
    %5 = vector.extract_strided_slice %3 {offsets = [0, 8], sizes = [16, 8], strides = [1, 1]} : vector<16x40xf32> to vector<16x8xf32>
    %6 = vector.shape_cast %5 : vector<16x8xf32> to vector<2x8x8xf32>
    %7 = vector.extract_strided_slice %3 {offsets = [0, 16], sizes = [16, 8], strides = [1, 1]} : vector<16x40xf32> to vector<16x8xf32>
    %8 = vector.shape_cast %7 : vector<16x8xf32> to vector<2x8x8xf32>
    %9 = vector.extract_strided_slice %6 {offsets = [0, 0, 0], sizes = [2, 8, 4], strides = [1, 1, 1]} : vector<2x8x8xf32> to vector<2x8x4xf32>
    %10 = vector.extract_strided_slice %8 {offsets = [0, 0, 0], sizes = [2, 8, 4], strides = [1, 1, 1]} : vector<2x8x8xf32> to vector<2x8x4xf32>
    "tpu.trace_start"() <{level = 10 : i32, message = "bqd,bkd->bqk"}> : () -> ()
    %cst_4 = arith.constant dense<0.000000e+00> : vector<2x8x8xf32>
    %11 = tpu.matmul %9, %10, %cst_4 {dimension_numbers = #tpu.dot_dimension_numbers<[2], [2], [1], [1], [0, 0, 0, 1, 1, 1], [0], [0]>} : vector<2x8x4xf32>, vector<2x8x4xf32>, vector<2x8x8xf32> -> vector<2x8x8xf32>
    "tpu.trace_stop"() : () -> ()
    %cst_5 = arith.constant dense<0xFF800000> : vector<2x8xf32>
    %12 = vector.multi_reduction <maximumf>, %11, %cst_5 [2] : vector<2x8x8xf32> to vector<2x8xf32>
    %13 = vector.shape_cast %12 : vector<2x8xf32> to vector<2x8x1xf32>
    %14 = vector.broadcast %13 : vector<2x8x1xf32> to vector<2x8x8xf32>
    %15 = arith.subf %11, %14 : vector<2x8x8xf32>
    %16 = math.exp %15 : vector<2x8x8xf32>
    %cst_6 = arith.constant dense<0.000000e+00> : vector<2x8xf32>
    %17 = vector.multi_reduction <add>, %16, %cst_6 [2] : vector<2x8x8xf32> to vector<2x8xf32>
    %18 = vector.shape_cast %17 : vector<2x8xf32> to vector<2x8x1xf32>
    %19 = tpu.reciprocal %18 {approx = true} : vector<2x8x1xf32> -> vector<2x8x1xf32>
    %20 = vector.broadcast %19 : vector<2x8x1xf32> to vector<2x8x8xf32>
    %21 = arith.mulf %16, %20 : vector<2x8x8xf32>
    %22 = vector.extract_strided_slice %3 {offsets = [0, 24], sizes = [16, 8], strides = [1, 1]} : vector<16x40xf32> to vector<16x8xf32>
    %23 = vector.shape_cast %22 : vector<16x8xf32> to vector<2x8x8xf32>
    "tpu.trace_start"() <{level = 10 : i32, message = "bqk,bkd->bqd"}> : () -> ()
    %cst_7 = arith.constant dense<0.000000e+00> : vector<2x8x8xf32>
    %24 = tpu.matmul %21, %23, %cst_7 {dimension_numbers = #tpu.dot_dimension_numbers<[2], [1], [1], [2], [0, 0, 0, 1, 1, 2], [0], [0]>} : vector<2x8x8xf32>, vector<2x8x8xf32>, vector<2x8x8xf32> -> vector<2x8x8xf32>
    "tpu.trace_stop"() : () -> ()
    %25 = vector.shape_cast %24 : vector<2x8x8xf32> to vector<16x8xf32>
    %26 = vector.extract_strided_slice %6 {offsets = [0, 0, 4], sizes = [2, 8, 4], strides = [1, 1, 1]} : vector<2x8x8xf32> to vector<2x8x4xf32>
    %27 = vector.extract_strided_slice %8 {offsets = [0, 0, 4], sizes = [2, 8, 4], strides = [1, 1, 1]} : vector<2x8x8xf32> to vector<2x8x4xf32>
    "tpu.trace_start"() <{level = 10 : i32, message = "bqd,bkd->bqk"}> : () -> ()
    %cst_8 = arith.constant dense<0.000000e+00> : vector<2x8x8xf32>
    %28 = tpu.matmul %26, %27, %cst_8 {dimension_numbers = #tpu.dot_dimension_numbers<[2], [2], [1], [1], [0, 0, 0, 1, 1, 1], [0], [0]>} : vector<2x8x4xf32>, vector<2x8x4xf32>, vector<2x8x8xf32> -> vector<2x8x8xf32>
    "tpu.trace_stop"() : () -> ()
    %cst_9 = arith.constant dense<0xFF800000> : vector<2x8xf32>
    %29 = vector.multi_reduction <maximumf>, %28, %cst_9 [2] : vector<2x8x8xf32> to vector<2x8xf32>
    %30 = vector.shape_cast %29 : vector<2x8xf32> to vector<2x8x1xf32>
    %31 = vector.broadcast %30 : vector<2x8x1xf32> to vector<2x8x8xf32>
    %32 = arith.subf %28, %31 : vector<2x8x8xf32>
    %33 = math.exp %32 : vector<2x8x8xf32>
    %cst_10 = arith.constant dense<0.000000e+00> : vector<2x8xf32>
    %34 = vector.multi_reduction <add>, %33, %cst_10 [2] : vector<2x8x8xf32> to vector<2x8xf32>
    %35 = vector.shape_cast %34 : vector<2x8xf32> to vector<2x8x1xf32>
    %36 = tpu.reciprocal %35 {approx = true} : vector<2x8x1xf32> -> vector<2x8x1xf32>
    %37 = vector.broadcast %36 : vector<2x8x1xf32> to vector<2x8x8xf32>
    %38 = arith.mulf %33, %37 : vector<2x8x8xf32>
    %39 = vector.extract_strided_slice %3 {offsets = [0, 32], sizes = [16, 8], strides = [1, 1]} : vector<16x40xf32> to vector<16x8xf32>
    %40 = vector.shape_cast %39 : vector<16x8xf32> to vector<2x8x8xf32>
    "tpu.trace_start"() <{level = 10 : i32, message = "bqk,bkd->bqd"}> : () -> ()
    %cst_11 = arith.constant dense<0.000000e+00> : vector<2x8x8xf32>
    %41 = tpu.matmul %38, %40, %cst_11 {dimension_numbers = #tpu.dot_dimension_numbers<[2], [1], [1], [2], [0, 0, 0, 1, 1, 2], [0], [0]>} : vector<2x8x8xf32>, vector<2x8x8xf32>, vector<2x8x8xf32> -> vector<2x8x8xf32>
    "tpu.trace_stop"() : () -> ()
    %42 = vector.shape_cast %41 : vector<2x8x8xf32> to vector<16x8xf32>
    %43 = arith.addf %25, %42 : vector<16x8xf32>
    %44 = arith.addf %4, %43 : vector<16x8xf32>
    %cst_12 = arith.constant dense<0.000000e+00> : vector<16xf32>
    %45 = vector.multi_reduction <add>, %44, %cst_12 [1] : vector<16x8xf32> to vector<16xf32>
    %46 = vector.shape_cast %45 : vector<16xf32> to vector<16x1xf32>
    %cst_13 = arith.constant 8.000000e+00 : f32
    %47 = vector.broadcast %cst_13 : f32 to vector<16x1xf32>
    %48 = arith.divf %46, %47 : vector<16x1xf32>
    %49 = vector.broadcast %48 : vector<16x1xf32> to vector<16x8xf32>
    %50 = arith.subf %44, %49 : vector<16x8xf32>
    %51 = arith.mulf %50, %50 : vector<16x8xf32>
    %cst_14 = arith.constant dense<0.000000e+00> : vector<16xf32>
    %52 = vector.multi_reduction <add>, %51, %cst_14 [1] : vector<16x8xf32> to vector<16xf32>
    %53 = vector.shape_cast %52 : vector<16xf32> to vector<16x1xf32>
    %cst_15 = arith.constant 8.000000e+00 : f32
    %54 = vector.broadcast %cst_15 : f32 to vector<16x1xf32>
    %55 = arith.divf %53, %54 : vector<16x1xf32>
    %cst_16 = arith.constant 9.99999974E-6 : f32
    %56 = vector.broadcast %cst_16 : f32 to vector<16x1xf32>
    %57 = arith.addf %55, %56 : vector<16x1xf32>
    %58 = math.rsqrt %57 : vector<16x1xf32>
    %59 = vector.broadcast %58 : vector<16x1xf32> to vector<16x8xf32>
    %60 = arith.mulf %50, %59 : vector<16x8xf32>
    %c0_17 = arith.constant 0 : index
    %c0_18 = arith.constant 0 : index
    %61 = vector.load %arg3[%c0_17, %c0_18] : memref<9x128xf32, #tpu.memory_space<vmem>>, vector<8x128xf32>
    %cst_19 = arith.constant dense<0.000000e+00> : vector<16x128xf32>
    %62 = tpu.matmul %60, %61, %cst_19 {dimension_numbers = #tpu.dot_dimension_numbers<[1], [0], [0], [1], [0, 0, 1, 1], [], []>} : vector<16x8xf32>, vector<8x128xf32>, vector<16x128xf32> -> vector<16x128xf32>
    %c8 = arith.constant 8 : index
    %c0_20 = arith.constant 0 : index
    %63 = vector.load %arg3[%c8, %c0_20] : memref<9x128xf32, #tpu.memory_space<vmem>>, vector<1x128xf32>
    %64 = vector.broadcast %63 : vector<1x128xf32> to vector<16x128xf32>
    %65 = arith.addf %62, %64 : vector<16x128xf32>
    %66 = vector.shape_cast %65 : vector<16x128xf32> to vector<2x8x128xf32>
    %c0_21 = arith.constant 0 : index
    %c0_22 = arith.constant 0 : index
    %c0_23 = arith.constant 0 : index
    %67 = vector.load %arg4[%c0_21, %c0_22, %c0_23] : memref<2x8x128xf32, #tpu.memory_space<vmem>>, vector<2x8x128xf32>
    tpu.vector_store %arg4[%c0_21, %c0_22, %c0_23], %66 {strides = array<i32>} : memref<2x8x128xf32, #tpu.memory_space<vmem>>, vector<2x8x128xf32>,
    return
  }
  func.func @transform_0(%arg0: i32) -> (i32, i32, i32) {
    %c0_i32 = arith.constant 0 : i32
    %c0_i32_0 = arith.constant 0 : i32
    %c0_i32_1 = arith.constant 0 : i32
    return %arg0, %c0_i32, %c0_i32_0 : i32, i32, i32
  }
  func.func @transform_1(%arg0: i32) -> (i32, i32) {
    %c0_i32 = arith.constant 0 : i32
    %c0_i32_0 = arith.constant 0 : i32
    %c0_i32_1 = arith.constant 0 : i32
    return %c0_i32, %c0_i32_0 : i32, i32
  }
  func.func @transform_2(%arg0: i32) -> (i32, i32) {
    %c0_i32 = arith.constant 0 : i32
    %c0_i32_0 = arith.constant 0 : i32
    %c0_i32_1 = arith.constant 0 : i32
    return %c0_i32, %c0_i32_0 : i32, i32
  }
  func.func @transform_3(%arg0: i32) -> (i32, i32, i32) {
    %c0_i32 = arith.constant 0 : i32
    %c0_i32_0 = arith.constant 0 : i32
    %c0_i32_1 = arith.constant 0 : i32
    return %arg0, %c0_i32, %c0_i32_0 : i32, i32, i32
  }
}

</mosaic_0001>

<bundles_post_ra>
// kernel: tpu_custom_call.1
= control target key start
LH: loop header
LB: loop body
LE: loop exit
PB: predicated region body
PF: predicated region fallthrough
CT: control target
= control target key end

     0   :  { %vm24_vm0 = vcmask 400384   ;;  %s1231_s0 = inlined_call_operand.vmem [shape: f32[2,8,49], index: 0, kind: input, shape index: {}]   ;;  %s1232_s1 = inlined_call_operand.vmem [shape: f32[49,40], index: 1, kind: input, shape index: {}]   ;;  %s1233_s2 = inlined_call_operand.vmem [shape: f32[9,128], index: 2, kind: input, shape index: {}]   ;;  %s1234_s3 = inlined_call_operand.hbm [shape: f32[2,8,128], index: 3, kind: output, shape index: {}]  }
   0x1   :  { %v17_v0 = vld [vmem:[%s1232_s1] sm:$0xff]  ;;  %v18_v1 = vld [vmem:[%s1232_s1 + $0x8] sm:$0xff]  ;;  %v19_v2 = vld [vmem:[%s1232_s1 + $0x10] sm:$0xff] }
   0x2   :  { %v1018_v3 = vpack.c.bf16 %v18_v1, %v17_v0  ;;  %v20_v4 = vld [vmem:[%s1232_s1 + $0x18] sm:$0xff]  ;;  %v21_v6 = vld [vmem:[%s1232_s1 + $0x20] sm:$0xff]  ;;  %v22_v7 = vld [vmem:[%s1232_s1 + $0x28] sm:$0xff] }
   0x3   :  { %v1022_v5 = vpack.c.bf16 %v20_v4, %v19_v2  ;;  %v15_v8 = vld [vmem:[%s1231_s0] sm:$0xff] }
   0x4   :  { %1019 = vmatprep.subr.bf16.mxu0 %v1018_v3  ;;  %970 = vmatprep.mubr.msk.f32.mxu0 %vm24_vm0, %v15_v8 }
   0x5   :  { %8 = vsyncpa [#allocation3], 0  ;;  %1021 = vmatpush3.bf16.msra.mxu0 %v1018_v3  ;;  %v1026_v9 = vpack.c.bf16 %v22_v7, %v21_v6  ;;  %v23_v10 = vld [vmem:[%s1232_s1 + $0x30] sm:$0x1]  ;;  %vm31_vm1 = vcmask 1040384   ;;  %v16_v11 = vld [vmem:[%s1231_s0 + $0x8] sm:$0xff] }
   0x6   :  { %1023 = vmatprep.subr.bf16.mxu0 %v1022_v5  ;;  %v1085_v12 = vmov 0.0   ;;  %vm1086_vm2 = vmmov 0   ;;  %s1087_s1 = smov 112   ;;  %s1088_s0 = smov 120   ;;  %vm115_vm3 = vcmask 31744   ;;  %vm269_vm4 = vcmask 64512  }
   0x7   :  { %973 = vmatprep.subr.mxu1 %v1085_v12  ;;  %975 = vmatprep.mubr.msk.f32.mxu1 %vm1086_vm2, %v1085_v12  ;;  %s1089_s30 = smov 104   ;;  %s1090_s4 = smov 108  }
   0x8   :  { %s1091_s5 = smov 116   ;;  %s1092_s6 = smov 96  }
   0x9   :  { %1025 = vmatpush3.bf16.msra.mxu0 %v1022_v5  ;;  %s1093_s11 = smov [#allocation2]  }
   0xa   :  { %1027 = vmatprep.subr.bf16.mxu0 %v1026_v9  ;;  %s899_s12 = sshll.u32 %s1093_s11, 4  ;;  %s900_s12 = int_to_ptr.vmem [resolvable:$true] %s899_s12 }
   0xb   :  { %s1061_s13 = scalar_lea.vmem %s900_s12, 256  ;;  %p1066_p1 = scmp.lt.s32.totalorder %s900_s12, %s900_s12 }
   0xc   :  { %p1062_p0 = scmp.ne.s32.totalorder %s900_s12, %s1061_s13  ;;  %p1067_p2 = scmp.lt.s32.totalorder %s1061_s13, %s1061_s13 }
   0xd   :  { %1029 = vmatpush3.bf16.msra.mxu0 %v1026_v9 }
   0xe   :  { %968 = vmatprep.subr.msk.mxu0 %vm31_vm1, %v23_v10  ;;  %p1068_p3 = por %p1067_p2, %p1066_p1 }
  0x10   :  { %p1069_p4 = pnand %p1068_p3, %p1062_p0 }
  0x11   :  { %969 = vmatpush3.msk.msra.mxu0 %vm31_vm1, %v23_v10 }
  0x12   :  { %971 = vmatmul.mubr.msk.f32.vlgmr.msra.gmra.mrb[0].mxu0 %vm24_vm0, %v16_v11  ;;  %993 = vmatprep.subr.mxu0 %v1085_v12 }
  0x13   :  { %995 = vmatprep.mubr.msk.f32.mxu0 %vm1086_vm2, %v1085_v12 }
  0xe5   :  { %v1151_v13 = vpop.f32.mrb[0].mxu0 }
  0xe6   :  { %193 = vrot.lane.b32.xlu1 %v1151_v13, %s1087_s1  ;;  %v1154_v14 = vpop.f32.mrb[1].mxu0 }
  0xe7   :  { %113 = vrot.lane.b32.xlu0 %v1154_v14, %s1087_s1 }
  0xea   :  { %191 = vrot.lane.b32.xlu1 %v1151_v13, %s1088_s0 }
  0xeb   :  { %111 = vrot.lane.b32.xlu0 %v1154_v14, %s1088_s0 }
 0x158   :  { %v194_v16 = vpop.permute.xlu1 %193 }
 0x159   :  { %v114_v15 = vpop.permute.xlu0 %113 }
 0x15a   :  { %974 = vmatpush3.xpose.msk.msra.mxu1 %vm115_vm3, %v114_v15 }
 0x15b   :  { %978 = vmatprep.subr.mxu1 %v1085_v12 }
 0x15c   :  { %v192_v18 = vpop.permute.xlu1 %191 }
 0x15d   :  { %v112_v17 = vpop.permute.xlu0 %111 }
 0x15e   :  { %976 = vmatmul.mubr.msk.f32.vlgmr.msra.gmra.mrb[0].mxu1 %vm115_vm3, %v112_v17 }
 0x15f   :  { %979 = vmatpush3.xpose.msk.msra.mxu1 %vm115_vm3, %v194_v16  ;;  %980 = vmatprep.mubr.msk.f32.mxu1 %vm1086_vm2, %v1085_v12 }
 0x160   :  { %983 = vmatprep.subr.mxu1 %v1085_v12 }
 0x162   :  { %981 = vmatmul.mubr.msk.f32.vlgmr.msra.gmra.mrb[2].mxu1 %vm115_vm3, %v192_v18 }
 0x163   :  { %985 = vmatprep.mubr.msk.f32.mxu1 %vm1086_vm2, %v1085_v12 }
 0x231   :  { %v186_v19 = vpop.f32.mrb[0].mxu1 }
 0x232   :  { %v977_v20 = vpop.f32.mrb[1].mxu1  ;;  %v270_v21 = vsel %vm269_vm4, %v186_v19, -inf }
 0x233   :  { %271 = vmax.xlane.f32.xlu0 %v270_v21 }
 0x235   :  { %v265_v22 = vpop.f32.mrb[2].mxu1 }
 0x236   :  { %v982_v23 = vpop.f32.mrb[3].mxu1  ;;  %v273_v24 = vsel %vm269_vm4, %v265_v22, -inf }
 0x237   :  { %274 = vmax.xlane.f32.xlu1 %v273_v24 }
 0x248   :  { %292 = vrot.lane.b32.xlu1 %v1154_v14, %s1089_s30 }
 0x24c   :  { %446 = vrot.lane.b32.xlu1 %v1154_v14, %s1090_s4 }
 0x250   :  { %524 = vrot.lane.b32.xlu1 %v1151_v13, %s1090_s4 }
 0x254   :  { %522 = vrot.lane.b32.xlu1 %v1151_v13, %s1091_s5 }
 0x2c0   :  { %v272_v25 = vpop.xlane.xlu0 %271 }
 0x2c1   :  { %v276_v26 = vsub.f32 %v186_v19, %v272_v25 }
 0x2c3   :  { %v278_v27 = vmul.f32 1.442695, %v276_v26 }
 0x2c4   :  { %v275_v28 = vpop.xlane.xlu1 %274 }
 0x2c5   :  { %1041 = vpow2.f32 %v278_v27  ;;  %v277_v33 = vsub.f32 %v265_v22, %v275_v28 }
 0x2c7   :  { %v280_v34 = vmul.f32 1.442695, %v277_v33 }
 0x2c8   :  { %v293_v29 = vpop.permute.xlu1 %292 }
 0x2c9   :  { %984 = vmatpush3.msra.mxu1 %v293_v29  ;;  %1043 = vpow2.f32 %v280_v34 }
 0x2ca   :  { %988 = vmatprep.subr.mxu1 %v1085_v12 }
 0x2cc   :  { %v447_v30 = vpop.permute.xlu1 %446 }
 0x2cd   :  { %994 = vmatpush3.xpose.msk.msra.mxu0 %vm115_vm3, %v447_v30 }
 0x2ce   :  { %1003 = vmatprep.subr.mxu0 %v1085_v12 }
 0x2cf   :  { %v1042_v31 = vpop.eup %1041 }
 0x2d0   :  { %v282_v32 = vsel %vm269_vm4, %v1042_v31, 0.0  ;;  %v525_v44 = vpop.permute.xlu1 %524 }
 0x2d1   :  { %283 = vadd.xlane.f32.xlu0 %v282_v32 }
 0x2d3   :  { %v1044_v35 = vpop.eup %1043 }
 0x2d4   :  { %v285_v36 = vsel %vm269_vm4, %v1044_v35, 0.0  ;;  %v523_v46 = vpop.permute.xlu1 %522 }
 0x2e7   :  { %368 = vrot.lane.b32.xlu0 %v1151_v13, %s1089_s30 }
 0x306   :  { %286 = vadd.xlane.f32.xlu0 %v285_v36 }
 0x31c   :  { %444 = vrot.lane.b32.xlu0 %v1154_v14, %s1091_s5 }
 0x35e   :  { %v284_v37 = vpop.xlane.xlu0 %283 }
 0x35f   :  { %1045 = vrcp.f32 %v284_v37 }
 0x362   :  { %v369_v40 = vpop.permute.xlu0 %368 }
 0x369   :  { %v1046_v38 = vpop.eup %1045 }
 0x36a   :  { %v290_v39 = vmul.f32 %v1046_v38, %v1042_v31 }
 0x36c   :  { %986 = vmatmul.mubr.msk.f32.vlgmr.msra.gmra.mrb[4].mxu1 %vm269_vm4, %v290_v39 }
 0x36d   :  { %989 = vmatpush3.msra.mxu1 %v369_v40  ;;  %990 = vmatprep.mubr.msk.f32.mxu1 %vm1086_vm2, %v1085_v12 }
 0x36e   :  { %998 = vmatprep.subr.mxu1 %v1085_v12 }
 0x393   :  { %v287_v41 = vpop.xlane.xlu0 %286 }
 0x394   :  { %1047 = vrcp.f32 %v287_v41 }
 0x397   :  { %v445_v42 = vpop.permute.xlu0 %444 }
 0x398   :  { %996 = vmatmul.mubr.msk.f32.vlgmr.msra.gmra.mrb[2].mxu0 %vm115_vm3, %v445_v42  ;;  %v925_v42 = vld [vmem:[%s1233_s2 + $0x8] ss:$0 sm:$0xff] }
 0x399   :  { %1005 = vmatprep.mubr.msk.f32.mxu0 %vm1086_vm2, %v1085_v12 }
 0x39e   :  { %v1048_v43 = vpop.eup %1047 }
 0x39f   :  { %v291_v45 = vmul.f32 %v1048_v43, %v1044_v35 }
 0x3a1   :  { %991 = vmatmul.mubr.msk.f32.vlgmr.msra.gmra.mrb[6].mxu1 %vm269_vm4, %v291_v45 }
 0x3a2   :  { %999 = vmatpush3.xpose.msk.msra.mxu1 %vm115_vm3, %v525_v44  ;;  %1000 = vmatprep.mubr.msk.f32.mxu1 %vm1086_vm2, %v1085_v12 }
 0x3a3   :  { %1008 = vmatprep.subr.mxu1 %v1085_v12 }
 0x3a5   :  { %1001 = vmatmul.mubr.msk.f32.vlgmr.msra.gmra.mrb[8].mxu1 %vm115_vm3, %v523_v46 }
 0x3a6   :  { %1010 = vmatprep.mubr.msk.f32.mxu1 %vm1086_vm2, %v1085_v12 }
 0x43f   :  { %v364_v47 = vpop.f32.mrb[4].mxu1 }
 0x440   :  { %v987_v48 = vpop.f32.mrb[5].mxu1 }
 0x46b   :  { %v518_v49 = vpop.f32.mrb[2].mxu0 }
 0x46c   :  { %v997_v50 = vpop.f32.mrb[3].mxu0  ;;  %v600_v51 = vsel %vm269_vm4, %v518_v49, -inf }
 0x46d   :  { %601 = vmax.xlane.f32.xlu0 %v600_v51 }
 0x474   :  { %v440_v52 = vpop.f32.mrb[6].mxu1 }
 0x475   :  { %v992_v53 = vpop.f32.mrb[7].mxu1 }
 0x478   :  { %v596_v54 = vpop.f32.mrb[8].mxu1 }
 0x479   :  { %v1002_v55 = vpop.f32.mrb[9].mxu1  ;;  %v603_v56 = vsel %vm269_vm4, %v596_v54, -inf }
 0x47a   :  { %604 = vmax.xlane.f32.xlu1 %v603_v56 }
 0x48b   :  { %622 = vrot.lane.b32.xlu1 %v1154_v14, %s1092_s6 }
 0x4fa   :  { %v602_v57 = vpop.xlane.xlu0 %601 }
 0x4fb   :  { %v606_v58 = vsub.f32 %v518_v49, %v602_v57 }
 0x4fd   :  { %v608_v59 = vmul.f32 1.442695, %v606_v58 }
 0x4ff   :  { %1049 = vpow2.f32 %v608_v59 }
 0x507   :  { %v605_v60 = vpop.xlane.xlu1 %604 }
 0x508   :  { %v607_v61 = vsub.f32 %v596_v54, %v605_v60 }
 0x509   :  { %v1050_v62 = vpop.eup %1049 }
 0x50a   :  { %v610_v63 = vmul.f32 1.442695, %v607_v61  ;;  %v612_v0 = vsel %vm269_vm4, %v1050_v62, 0.0 }
 0x50b   :  { %613 = vadd.xlane.f32.xlu0 %v612_v0  ;;  %v623_v1 = vpop.permute.xlu1 %622 }
 0x50c   :  { %1051 = vpow2.f32 %v610_v63  ;;  %1004 = vmatpush3.msra.mxu0 %v623_v1 }
 0x516   :  { %v1052_v2 = vpop.eup %1051 }
 0x517   :  { %v615_v3 = vsel %vm269_vm4, %v1052_v2, 0.0 }
 0x518   :  { %616 = vadd.xlane.f32.xlu0 %v615_v3 }
 0x52e   :  { %698 = vrot.lane.b32.xlu0 %v1151_v13, %s1092_s6 }
 0x598   :  { %v614_v4 = vpop.xlane.xlu0 %613 }
 0x599   :  { %1053 = vrcp.f32 %v614_v4 }
 0x5a3   :  { %v1054_v5 = vpop.eup %1053 }
 0x5a4   :  { %v620_v6 = vmul.f32 %v1054_v5, %v1050_v62 }
 0x5a5   :  { %v617_v7 = vpop.xlane.xlu0 %616 }
 0x5a6   :  { %1055 = vrcp.f32 %v617_v7  ;;  %1006 = vmatmul.mubr.msk.f32.vlgmr.msra.gmra.mrb[4].mxu0 %vm269_vm4, %v620_v6 }
 0x5a9   :  { %v699_v8 = vpop.permute.xlu0 %698 }
 0x5aa   :  { %1009 = vmatpush3.msra.mxu1 %v699_v8 }
 0x5b0   :  { %v1056_v9 = vpop.eup %1055 }
 0x5b1   :  { %v621_v10 = vmul.f32 %v1056_v9, %v1052_v2 }
 0x5b3   :  { %1011 = vmatmul.mubr.msk.f32.vlgmr.msra.gmra.mrb[10].mxu1 %vm269_vm4, %v621_v10 }
 0x679   :  { %v694_v11 = vpop.f32.mrb[4].mxu0 }
 0x67a   :  { %v774_v12 = vadd.f32 %v694_v11, %v364_v47  ;;  %v1007_v15 = vpop.f32.mrb[5].mxu0 }
 0x67c   :  { %v776_v16 = vadd.f32 %v774_v12, %v1154_v14 }
 0x67e   :  { %v778_v17 = vsel %vm269_vm4, %v776_v16, 0.0 }
 0x67f   :  { %779 = vadd.xlane.f32.xlu1 %v778_v17 }
 0x686   :  { %v770_v18 = vpop.f32.mrb[10].mxu1 }
 0x687   :  { %v775_v19 = vadd.f32 %v770_v18, %v440_v52  ;;  %v1012_v20 = vpop.f32.mrb[11].mxu1 }
 0x689   :  { %v777_v21 = vadd.f32 %v1151_v13, %v775_v19  ;;  %v805_v13 = vld [vmem:[%s1233_s2] sm:$0xff] }
 0x68a   :  { %1013 = vmatprep.subr.mxu0 %v805_v13 }
 0x68b   :  { %v781_v22 = vsel %vm269_vm4, %v777_v21, 0.0  ;;  %1014 = vmatpush3.msra.mxu0 %v805_v13 }
 0x68c   :  { %782 = vadd.xlane.f32.xlu0 %v781_v22 }
 0x70c   :  { %v780_v23 = vpop.xlane.xlu1 %779 }
 0x70d   :  { %v785_v24 = vmul.f32 0.125, %v780_v23 }
 0x70f   :  { %v787_v25 = vsub.f32 %v776_v16, %v785_v24 }
 0x711   :  { %v789_v26 = vmul.f32 %v787_v25, %v787_v25 }
 0x713   :  { %v791_v27 = vsel %vm269_vm4, %v789_v26, 0.0 }
 0x714   :  { %792 = vadd.xlane.f32.xlu1 %v791_v27 }
 0x719   :  { %v783_v28 = vpop.xlane.xlu0 %782 }
 0x71a   :  { %v786_v14 = vmul.f32 0.125, %v783_v28 }
 0x71c   :  { %v788_v29 = vsub.f32 %v777_v21, %v786_v14 }
 0x71e   :  { %v790_v30 = vmul.f32 %v788_v29, %v788_v29 }
 0x720   :  { %v794_v31 = vsel %vm269_vm4, %v790_v30, 0.0 }
 0x721   :  { %795 = vadd.xlane.f32.xlu0 %v794_v31 }
 0x7a1   :  { %v793_v32 = vpop.xlane.xlu1 %792 }
 0x7a2   :  { %v797_v33 = vmul.f32 0.125, %v793_v32 }
 0x7a4   :  { %v799_v34 = vadd.f32 1e-05, %v797_v33 }
 0x7a6   :  { %1057 = vrsqrt.f32 %v799_v34 }
 0x7ae   :  { %v796_v35 = vpop.xlane.xlu0 %795 }
 0x7af   :  { %v798_v36 = vmul.f32 0.125, %v796_v35 }
 0x7b0   :  { %v1058_v37 = vpop.eup %1057 }
 0x7b1   :  { %v800_v38 = vadd.f32 1e-05, %v798_v36  ;;  %v803_v39 = vmul.f32 %v1058_v37, %v787_v25 }
 0x7b3   :  { %1059 = vrsqrt.f32 %v800_v38  ;;  %1015 = vmatprep.mubr.msk.f32.mxu0 %vm269_vm4, %v803_v39 }
 0x7bd   :  { %v1060_v40 = vpop.eup %1059 }
 0x7be   :  { %v804_v41 = vmul.f32 %v1060_v40, %v788_v29 }
 0x7c0   :  { %1016 = vmatmul.mubr.msk.f32.vlgmr.msra.gmra.mrb[6].mxu0 %vm269_vm4, %v804_v41 }
 0x893   :  { %v1017_v43 = vpop.f32.mrb[6].mxu0 }
 0x894   :  { %v889_v44 = vadd.f32 %v1017_v43, %v925_v42  ;;  %v883_v45 = vpop.f32.mrb[7].mxu0 }
 0x895   :  { %v884_v46 = vadd.f32 %v925_v42, %v883_v45 }
 0x896   :  { %893 = vst [vmem:[#allocation2 + $0x8] sm:$0xff] %v889_v44 }
 0x897   :  { %892 = vst [vmem:[#allocation2] sm:$0xff] %v884_v46 }
 0x898   :  { %1072 = shalt.err (!%p1069_p4)
}
 0x899   :  { %s1073_s2 = scalar_lea.hbm %s1234_s3, 256 }
 0x89a   :  { %p1074_p5 = scmp.ne.s32.totalorder %s1234_s3, %s1073_s2  ;;  %p1077_p6 = scmp.lt.u32.totalorder %s1073_s2, %s1234_s3 }
 0x89c   :  { %p1079_p7 = pnand %p1077_p6, %p1074_p5 }
 0x89e   :  { %1082 = shalt.err (!%p1079_p7)
}
 0x89f   :  { %s1094_s20 = smov 128   ;;  %s1095_s21 = smov 8  }
 0x8a0   :  { %905 = dma.vmem_to_hbm [thread:$0]  %s900_s12, 256, %s1234_s3, [#allocation3], %s1094_s20, %s1094_s20, %s1095_s21  }
 0x8a1   :  { %1083 = dma.done.wait [#allocation3], 256  }
 0x8a2   :  { %1084 = vsyncadd [#allocation3], 4294967040 }
 0x8a3   :  { %909 = vsyncpa [#allocation3], 1 }

</bundles_post_ra>
